<compile_context>
chip_gen: v7x
topology: tpu7x:2x2x1
jax: 0.10.0
libtpu: 0.0.40
codegen_flags: <defaults>
</compile_context>

<pallas_src>
import math

import jax
import jax.numpy as jnp
from jax.experimental import pallas as pl
from jax.experimental.pallas import tpu as pltpu


def _mha_kernel(x_ref, wqv_ref, wkt_ref, wfc_ref, bias_ref, o_ref, stage_ref):
    """One batch row per grid step; all H heads fused in the body.

    x_ref:     (1, S, n)    activations for batch b (the only per-step stream)
    wqv_ref:   (n, 2*n)     [W_Q | W_V] column-concatenated, columns grouped by head
    wkt_ref:   (H, d_k, n)  W_K with (n, d_k) axes swapped (only diag(K) is used)
    wfc_ref:   (n, n)       final Linear weight, input-major (== fc.weight.T)
    bias_ref:  (1, n)       final Linear bias
    o_ref:     (1, 1, n)    output row for batch b
    stage_ref: (1, n) f32   staging row for the concatenated head outputs
    """
    x2 = x_ref[0].astype(jnp.float32)                          # (S, n)
    wkt = wkt_ref[...].astype(jnp.float32)                     # (H, d_k, n)
    num_heads, d_k, n = wkt.shape
    inv_sqrt_dk = 1.0 / math.sqrt(d_k)

    # Fused Q|V projection for all heads: one lane-dense MXU pass, f32 accum.
    qv = jnp.dot(x2, wqv_ref[...].astype(jnp.float32),
                 preferred_element_type=jnp.float32)           # (S, 2n)

    # diag(K) without computing K: K[h,k,k] = sum_c x[k,c] * W_K[h,c,k].
    k_diag = jnp.sum(x2[None, :, :] * wkt, axis=-1)            # (H, d_k)

    # Static unrolled loop over heads: independent MXU/EUP/XLU chains for the
    # scheduler to interleave; no cross-iteration state, no pl.when.
    for h in range(num_heads):
        q_h = qv[:, h * d_k:(h + 1) * d_k]                     # (S, d_k)
        v_h = qv[:, n + h * d_k:n + (h + 1) * d_k]             # (S, d_k)
        kd_h = k_diag[h:h + 1, :]                              # (1, d_k)

        # Row-oriented scores (1, S): softmax reductions stay on the lane axis.
        scores = jnp.einsum('od,sd->os', kd_h, q_h,
                            preferred_element_type=jnp.float32) * inv_sqrt_dk
        m = jnp.max(scores, axis=-1, keepdims=True)            # (1, 1)
        e = jnp.exp(scores - m)                                # (1, S)
        attn = e / jnp.sum(e, axis=-1, keepdims=True)          # (1, S)

        # Head output on the MXU: (1, S) @ (S, d_k) -> (1, d_k); stage it into
        # its lane slice of the concatenated row (static offset, masked store).
        stage_ref[:, h * d_k:(h + 1) * d_k] = jnp.dot(
            attn, v_h, preferred_element_type=jnp.float32)

    # Single fused output projection: (1, n) @ (n, n) + bias.
    out = jnp.dot(stage_ref[...], wfc_ref[...].astype(jnp.float32),
                  preferred_element_type=jnp.float32)
    out = out + bias_ref[...].astype(jnp.float32)
    o_ref[0] = out.astype(o_ref.dtype)


def multi_head_attention_forward(x, w_q, w_k, w_v, w_fc_t, b_fc):
    """Pallas equivalent of MultiHeadAttention.forward.

    Args:
      x:      (B, S, n) activations, S == d_k (required by the module's 'ilkk' einsum).
      w_q/w_k/w_v: (H, n, d_k) per-head projection weights.
      w_fc_t: (n, n) final Linear weight in INPUT-major layout (== fc.weight.T),
              so y = concat_heads @ w_fc_t + b_fc.
      b_fc:   (n,) final Linear bias.
    Returns:
      (B, n) output.
    """
    B, S, n = x.shape
    H, n2, d_k = w_q.shape
    assert n2 == n and w_k.shape == w_q.shape and w_v.shape == w_q.shape
    assert H * d_k == n, "n must equal num_heads * d_k"
    assert S == d_k, "the module's scores einsum ('ilkk') requires seq_len == d_k"
    assert w_fc_t.shape == (n, n) and b_fc.shape == (n,)

    # One-time PARAMETER layout prep (weights only; no per-step activation work):
    #   W_Q|W_V -> (n, 2n), columns grouped by head, so the kernel issues a
    #   single lane-dense (S, n) @ (n, 2n) projection pass for Q and V.
    w_q_cat = jnp.transpose(w_q, (1, 0, 2)).reshape(n, H * d_k)   # [c, h*d_k+k] = W_Q[h,c,k]
    w_v_cat = jnp.transpose(w_v, (1, 0, 2)).reshape(n, H * d_k)
    w_qv = jnp.concatenate([w_q_cat, w_v_cat], axis=1)            # (n, 2n)
    #   W_K -> (H, d_k, n) so diag(K) is a VPU multiply + lane reduce (no K matmul).
    wk_t = jnp.transpose(w_k, (0, 2, 1))                          # [h, k, c] = W_K[h, c, k]
    bias2d = b_fc.reshape(1, n)

    out3 = pl.pallas_call(
        _mha_kernel,
        out_shape=jax.ShapeDtypeStruct((B, 1, n), x.dtype),
        grid=(B,),
        in_specs=[
            pl.BlockSpec((1, S, n), lambda b: (b, 0, 0)),       # x[b]: per-step stream
            pl.BlockSpec((n, 2 * n), lambda b: (0, 0)),         # fused Q|V weights (resident)
            pl.BlockSpec((H, d_k, n), lambda b: (0, 0, 0)),     # W_K^T (resident)
            pl.BlockSpec((n, n), lambda b: (0, 0)),             # fc weight (resident)
            pl.BlockSpec((1, n), lambda b: (0, 0)),             # fc bias (resident)
        ],
        out_specs=pl.BlockSpec((1, 1, n), lambda b: (b, 0, 0)),
        scratch_shapes=[pltpu.VMEM((1, n), jnp.float32)],       # head-output staging row
        compiler_params=pltpu.CompilerParams(
            # Batch shards across v7x's 2 TensorCores; no-op on v5e/v6e.
            dimension_semantics=("parallel",),
        ),
    )(x, w_qv, wk_t, w_fc_t, bias2d)

    return out3.reshape(B, n)


def _mha_reference(x, w_q, w_k, w_v, w_fc_t, b_fc):
    """Pure-JAX transcription of the PyTorch forward (high-precision matmuls)."""
    hp = jax.lax.Precision.HIGHEST
    d_k = w_q.shape[-1]
    Q = jnp.einsum('ijk,lkm->iljm', x, w_q, precision=hp)
    K = jnp.einsum('ijk,lkm->iljm', x, w_k, precision=hp)
    V = jnp.einsum('ijk,lkm->iljm', x, w_v, precision=hp)
    scores = jnp.einsum('iljk,ilkk->ilj', Q, K, precision=hp) / math.sqrt(d_k)
    attn = jax.nn.softmax(scores, axis=-1)
    out = jnp.einsum('ilj,iljk->ilk', attn, V, precision=hp)
    out = out.reshape(out.shape[0], -1)                  # (B, H*d_k) == (B, n)
    return jnp.dot(out, w_fc_t, precision=hp) + b_fc


if __name__ == "__main__":
    # Small, deterministic, lane/sublane-aligned shapes consistent with the
    # module: n = 128 (full lane width), num_heads = 4, d_k = 32, and
    # seq_len = d_k = 32 as required by the 'ilkk' einsum.
    B, num_heads, n = 2, 4, 128
    d_k = n // num_heads
    S = d_k

    key = jax.random.PRNGKey(0)
    kx, kq, kk, kv, kw, kb = jax.random.split(key, 6)

    # Weights scaled by 1/sqrt(n) purely to keep the synthetic softmax
    # well-conditioned for the numerical check; semantics are unchanged.
    wscale = 1.0 / math.sqrt(n)
    x = jax.random.normal(kx, (B, S, n), dtype=jnp.float32)
    w_q = jax.random.normal(kq, (num_heads, n, d_k), dtype=jnp.float32) * wscale
    w_k = jax.random.normal(kk, (num_heads, n, d_k), dtype=jnp.float32) * wscale
    w_v = jax.random.normal(kv, (num_heads, n, d_k), dtype=jnp.float32) * wscale
    w_fc_t = jax.random.normal(kw, (n, n), dtype=jnp.float32) * wscale  # == fc.weight.T
    b_fc = jax.random.normal(kb, (n,), dtype=jnp.float32)

    mha = jax.jit(multi_head_attention_forward)
    out = mha(x, w_q, w_k, w_v, w_fc_t, b_fc)
    out = jax.block_until_ready(out)

    ref = _mha_reference(x, w_q, w_k, w_v, w_fc_t, b_fc)
    assert out.shape == (B, n)
    assert jnp.allclose(out, ref, atol=2e-2, rtol=2e-2), "mismatch vs reference"

    print("KERNEL_OK")
</pallas_src>

<mosaic_0001>
module attributes {stable_mosaic.version = 11 : i64} {
  func.func @_mha_kernel(%arg0: i32, %arg1: memref<1x32x128xf32, #tpu.memory_space<vmem>>, %arg2: memref<128x256xf32, #tpu.memory_space<vmem>>, %arg3: memref<4x32x128xf32, #tpu.memory_space<vmem>>, %arg4: memref<128x128xf32, #tpu.memory_space<vmem>>, %arg5: memref<1x128xf32, #tpu.memory_space<vmem>>, %arg6: memref<1x1x128xf32, #tpu.memory_space<vmem>>, %arg7: memref<1x128xf32, #tpu.memory_space<vmem>>) attributes {dimension_semantics = [#tpu.dimension_semantics<parallel>], iteration_bounds = array<i64: 2>, scalar_prefetch = 0 : i64, scratch_operands = 1 : i64, tpu.core_type = #tpu.core_type<tc>, window_params = [{transform_indices = @transform_0, window_bounds = array<i64: 1, 32, 128>}, {pipeline_mode = #tpu.pipeline_mode<synchronous>, transform_indices = @transform_1, window_bounds = array<i64: 128, 256>}, {pipeline_mode = #tpu.pipeline_mode<synchronous>, transform_indices = @transform_2, window_bounds = array<i64: 4, 32, 128>}, {pipeline_mode = #tpu.pipeline_mode<synchronous>, transform_indices = @transform_3, window_bounds = array<i64: 128, 128>}, {pipeline_mode = #tpu.pipeline_mode<synchronous>, transform_indices = @transform_4, window_bounds = array<i64: 1, 128>}, {transform_indices = @transform_5, window_bounds = array<i64: 1, 1, 128>}]} {
    %c0 = arith.constant 0 : index
    %c0_0 = arith.constant 0 : index
    %c0_1 = arith.constant 0 : index
    %0 = vector.load %arg1[%c0, %c0_0, %c0_1] : memref<1x32x128xf32, #tpu.memory_space<vmem>>, vector<1x32x128xf32>
    %1 = vector.shape_cast %0 : vector<1x32x128xf32> to vector<32x128xf32>
    %c0_2 = arith.constant 0 : index
    %c0_3 = arith.constant 0 : index
    %c0_4 = arith.constant 0 : index
    %2 = vector.load %arg3[%c0_2, %c0_3, %c0_4] : memref<4x32x128xf32, #tpu.memory_space<vmem>>, vector<4x32x128xf32>
    %c0_5 = arith.constant 0 : index
    %c0_6 = arith.constant 0 : index
    %3 = vector.load %arg2[%c0_5, %c0_6] : memref<128x256xf32, #tpu.memory_space<vmem>>, vector<128x256xf32>
    %cst = arith.constant dense<0.000000e+00> : vector<32x256xf32>
    %4 = tpu.matmul %1, %3, %cst {dimension_numbers = #tpu.dot_dimension_numbers<[1], [0], [0], [1], [0, 0, 1, 1], [], []>} : vector<32x128xf32>, vector<128x256xf32>, vector<32x256xf32> -> vector<32x256xf32>
    %5 = vector.shape_cast %1 : vector<32x128xf32> to vector<1x32x128xf32>
    %6 = vector.broadcast %5 : vector<1x32x128xf32> to vector<4x32x128xf32>
    %7 = arith.mulf %6, %2 : vector<4x32x128xf32>
    %cst_7 = arith.constant dense<0.000000e+00> : vector<4x32xf32>
    %8 = vector.multi_reduction <add>, %7, %cst_7 [2] : vector<4x32x128xf32> to vector<4x32xf32>
    %9 = vector.extract_strided_slice %4 {offsets = [0, 0], sizes = [32, 32], strides = [1, 1]} : vector<32x256xf32> to vector<32x32xf32>
    %10 = vector.extract_strided_slice %4 {offsets = [0, 128], sizes = [32, 32], strides = [1, 1]} : vector<32x256xf32> to vector<32x32xf32>
    %11 = vector.extract_strided_slice %8 {offsets = [0, 0], sizes = [1, 32], strides = [1, 1]} : vector<4x32xf32> to vector<1x32xf32>
    "tpu.trace_start"() <{level = 10 : i32, message = "od,sd->os"}> : () -> ()
    %cst_8 = arith.constant dense<0.000000e+00> : vector<1x32xf32>
    %12 = tpu.matmul %11, %9, %cst_8 {dimension_numbers = #tpu.dot_dimension_numbers<[1], [1], [0], [0], [0, 0, 1, 0], [], []>} : vector<1x32xf32>, vector<32x32xf32>, vector<1x32xf32> -> vector<1x32xf32>
    "tpu.trace_stop"() : () -> ()
    %cst_9 = arith.constant 0.176776692 : f32
    %13 = vector.broadcast %cst_9 : f32 to vector<1x32xf32>
    %14 = arith.mulf %12, %13 : vector<1x32xf32>
    %cst_10 = arith.constant dense<0xFF800000> : vector<1xf32>
    %15 = vector.multi_reduction <maximumf>, %14, %cst_10 [1] : vector<1x32xf32> to vector<1xf32>
    %16 = vector.shape_cast %15 : vector<1xf32> to vector<1x1xf32>
    %17 = vector.broadcast %16 : vector<1x1xf32> to vector<1x32xf32>
    %18 = arith.subf %14, %17 : vector<1x32xf32>
    %19 = math.exp %18 : vector<1x32xf32>
    %cst_11 = arith.constant dense<0.000000e+00> : vector<1xf32>
    %20 = vector.multi_reduction <add>, %19, %cst_11 [1] : vector<1x32xf32> to vector<1xf32>
    %21 = vector.shape_cast %20 : vector<1xf32> to vector<1x1xf32>
    %22 = vector.broadcast %21 : vector<1x1xf32> to vector<1x32xf32>
    %23 = arith.divf %19, %22 : vector<1x32xf32>
    %cst_12 = arith.constant dense<0.000000e+00> : vector<1x32xf32>
    %24 = tpu.matmul %23, %10, %cst_12 {dimension_numbers = #tpu.dot_dimension_numbers<[1], [0], [0], [1], [0, 0, 1, 1], [], []>} : vector<1x32xf32>, vector<32x32xf32>, vector<1x32xf32> -> vector<1x32xf32>
    %c0_13 = arith.constant 0 : index
    %c0_14 = arith.constant 0 : index
    %25 = vector.load %arg7[%c0_13, %c0_14] : memref<1x128xf32, #tpu.memory_space<vmem>>, vector<1x32xf32>
    tpu.vector_store %arg7[%c0_13, %c0_14], %24 {strides = array<i32>} : memref<1x128xf32, #tpu.memory_space<vmem>>, vector<1x32xf32>,
    %26 = vector.extract_strided_slice %4 {offsets = [0, 32], sizes = [32, 32], strides = [1, 1]} : vector<32x256xf32> to vector<32x32xf32>
    %27 = vector.extract_strided_slice %4 {offsets = [0, 160], sizes = [32, 32], strides = [1, 1]} : vector<32x256xf32> to vector<32x32xf32>
    %28 = vector.extract_strided_slice %8 {offsets = [1, 0], sizes = [1, 32], strides = [1, 1]} : vector<4x32xf32> to vector<1x32xf32>
    "tpu.trace_start"() <{level = 10 : i32, message = "od,sd->os"}> : () -> ()
    %cst_15 = arith.constant dense<0.000000e+00> : vector<1x32xf32>
    %29 = tpu.matmul %28, %26, %cst_15 {dimension_numbers = #tpu.dot_dimension_numbers<[1], [1], [0], [0], [0, 0, 1, 0], [], []>} : vector<1x32xf32>, vector<32x32xf32>, vector<1x32xf32> -> vector<1x32xf32>
    "tpu.trace_stop"() : () -> ()
    %cst_16 = arith.constant 0.176776692 : f32
    %30 = vector.broadcast %cst_16 : f32 to vector<1x32xf32>
    %31 = arith.mulf %29, %30 : vector<1x32xf32>
    %cst_17 = arith.constant dense<0xFF800000> : vector<1xf32>
    %32 = vector.multi_reduction <maximumf>, %31, %cst_17 [1] : vector<1x32xf32> to vector<1xf32>
    %33 = vector.shape_cast %32 : vector<1xf32> to vector<1x1xf32>
    %34 = vector.broadcast %33 : vector<1x1xf32> to vector<1x32xf32>
    %35 = arith.subf %31, %34 : vector<1x32xf32>
    %36 = math.exp %35 : vector<1x32xf32>
    %cst_18 = arith.constant dense<0.000000e+00> : vector<1xf32>
    %37 = vector.multi_reduction <add>, %36, %cst_18 [1] : vector<1x32xf32> to vector<1xf32>
    %38 = vector.shape_cast %37 : vector<1xf32> to vector<1x1xf32>
    %39 = vector.broadcast %38 : vector<1x1xf32> to vector<1x32xf32>
    %40 = arith.divf %36, %39 : vector<1x32xf32>
    %cst_19 = arith.constant dense<0.000000e+00> : vector<1x32xf32>
    %41 = tpu.matmul %40, %27, %cst_19 {dimension_numbers = #tpu.dot_dimension_numbers<[1], [0], [0], [1], [0, 0, 1, 1], [], []>} : vector<1x32xf32>, vector<32x32xf32>, vector<1x32xf32> -> vector<1x32xf32>
    %c0_20 = arith.constant 0 : index
    %c32 = arith.constant 32 : index
    %42 = vector.load %arg7[%c0_20, %c32] : memref<1x128xf32, #tpu.memory_space<vmem>>, vector<1x32xf32>
    tpu.vector_store %arg7[%c0_20, %c32], %41 {strides = array<i32>} : memref<1x128xf32, #tpu.memory_space<vmem>>, vector<1x32xf32>,
    %43 = vector.extract_strided_slice %4 {offsets = [0, 64], sizes = [32, 32], strides = [1, 1]} : vector<32x256xf32> to vector<32x32xf32>
    %44 = vector.extract_strided_slice %4 {offsets = [0, 192], sizes = [32, 32], strides = [1, 1]} : vector<32x256xf32> to vector<32x32xf32>
    %45 = vector.extract_strided_slice %8 {offsets = [2, 0], sizes = [1, 32], strides = [1, 1]} : vector<4x32xf32> to vector<1x32xf32>
    "tpu.trace_start"() <{level = 10 : i32, message = "od,sd->os"}> : () -> ()
    %cst_21 = arith.constant dense<0.000000e+00> : vector<1x32xf32>
    %46 = tpu.matmul %45, %43, %cst_21 {dimension_numbers = #tpu.dot_dimension_numbers<[1], [1], [0], [0], [0, 0, 1, 0], [], []>} : vector<1x32xf32>, vector<32x32xf32>, vector<1x32xf32> -> vector<1x32xf32>
    "tpu.trace_stop"() : () -> ()
    %cst_22 = arith.constant 0.176776692 : f32
    %47 = vector.broadcast %cst_22 : f32 to vector<1x32xf32>
    %48 = arith.mulf %46, %47 : vector<1x32xf32>
    %cst_23 = arith.constant dense<0xFF800000> : vector<1xf32>
    %49 = vector.multi_reduction <maximumf>, %48, %cst_23 [1] : vector<1x32xf32> to vector<1xf32>
    %50 = vector.shape_cast %49 : vector<1xf32> to vector<1x1xf32>
    %51 = vector.broadcast %50 : vector<1x1xf32> to vector<1x32xf32>
    %52 = arith.subf %48, %51 : vector<1x32xf32>
    %53 = math.exp %52 : vector<1x32xf32>
    %cst_24 = arith.constant dense<0.000000e+00> : vector<1xf32>
    %54 = vector.multi_reduction <add>, %53, %cst_24 [1] : vector<1x32xf32> to vector<1xf32>
    %55 = vector.shape_cast %54 : vector<1xf32> to vector<1x1xf32>
    %56 = vector.broadcast %55 : vector<1x1xf32> to vector<1x32xf32>
    %57 = arith.divf %53, %56 : vector<1x32xf32>
    %cst_25 = arith.constant dense<0.000000e+00> : vector<1x32xf32>
    %58 = tpu.matmul %57, %44, %cst_25 {dimension_numbers = #tpu.dot_dimension_numbers<[1], [0], [0], [1], [0, 0, 1, 1], [], []>} : vector<1x32xf32>, vector<32x32xf32>, vector<1x32xf32> -> vector<1x32xf32>
    %c0_26 = arith.constant 0 : index
    %c64 = arith.constant 64 : index
    %59 = vector.load %arg7[%c0_26, %c64] : memref<1x128xf32, #tpu.memory_space<vmem>>, vector<1x32xf32>
    tpu.vector_store %arg7[%c0_26, %c64], %58 {strides = array<i32>} : memref<1x128xf32, #tpu.memory_space<vmem>>, vector<1x32xf32>,
    %60 = vector.extract_strided_slice %4 {offsets = [0, 96], sizes = [32, 32], strides = [1, 1]} : vector<32x256xf32> to vector<32x32xf32>
    %61 = vector.extract_strided_slice %4 {offsets = [0, 224], sizes = [32, 32], strides = [1, 1]} : vector<32x256xf32> to vector<32x32xf32>
    %62 = vector.extract_strided_slice %8 {offsets = [3, 0], sizes = [1, 32], strides = [1, 1]} : vector<4x32xf32> to vector<1x32xf32>
    "tpu.trace_start"() <{level = 10 : i32, message = "od,sd->os"}> : () -> ()
    %cst_27 = arith.constant dense<0.000000e+00> : vector<1x32xf32>
    %63 = tpu.matmul %62, %60, %cst_27 {dimension_numbers = #tpu.dot_dimension_numbers<[1], [1], [0], [0], [0, 0, 1, 0], [], []>} : vector<1x32xf32>, vector<32x32xf32>, vector<1x32xf32> -> vector<1x32xf32>
    "tpu.trace_stop"() : () -> ()
    %cst_28 = arith.constant 0.176776692 : f32
    %64 = vector.broadcast %cst_28 : f32 to vector<1x32xf32>
    %65 = arith.mulf %63, %64 : vector<1x32xf32>
    %cst_29 = arith.constant dense<0xFF800000> : vector<1xf32>
    %66 = vector.multi_reduction <maximumf>, %65, %cst_29 [1] : vector<1x32xf32> to vector<1xf32>
    %67 = vector.shape_cast %66 : vector<1xf32> to vector<1x1xf32>
    %68 = vector.broadcast %67 : vector<1x1xf32> to vector<1x32xf32>
    %69 = arith.subf %65, %68 : vector<1x32xf32>
    %70 = math.exp %69 : vector<1x32xf32>
    %cst_30 = arith.constant dense<0.000000e+00> : vector<1xf32>
    %71 = vector.multi_reduction <add>, %70, %cst_30 [1] : vector<1x32xf32> to vector<1xf32>
    %72 = vector.shape_cast %71 : vector<1xf32> to vector<1x1xf32>
    %73 = vector.broadcast %72 : vector<1x1xf32> to vector<1x32xf32>
    %74 = arith.divf %70, %73 : vector<1x32xf32>
    %cst_31 = arith.constant dense<0.000000e+00> : vector<1x32xf32>
    %75 = tpu.matmul %74, %61, %cst_31 {dimension_numbers = #tpu.dot_dimension_numbers<[1], [0], [0], [1], [0, 0, 1, 1], [], []>} : vector<1x32xf32>, vector<32x32xf32>, vector<1x32xf32> -> vector<1x32xf32>
    %c0_32 = arith.constant 0 : index
    %c96 = arith.constant 96 : index
    %76 = vector.load %arg7[%c0_32, %c96] : memref<1x128xf32, #tpu.memory_space<vmem>>, vector<1x32xf32>
    tpu.vector_store %arg7[%c0_32, %c96], %75 {strides = array<i32>} : memref<1x128xf32, #tpu.memory_space<vmem>>, vector<1x32xf32>,
    %c0_33 = arith.constant 0 : index
    %c0_34 = arith.constant 0 : index
    %77 = vector.load %arg7[%c0_33, %c0_34] : memref<1x128xf32, #tpu.memory_space<vmem>>, vector<1x128xf32>
    %c0_35 = arith.constant 0 : index
    %c0_36 = arith.constant 0 : index
    %78 = vector.load %arg4[%c0_35, %c0_36] : memref<128x128xf32, #tpu.memory_space<vmem>>, vector<128x128xf32>
    %cst_37 = arith.constant dense<0.000000e+00> : vector<1x128xf32>
    %79 = tpu.matmul %77, %78, %cst_37 {dimension_numbers = #tpu.dot_dimension_numbers<[1], [0], [0], [1], [0, 0, 1, 1], [], []>} : vector<1x128xf32>, vector<128x128xf32>, vector<1x128xf32> -> vector<1x128xf32>
    %c0_38 = arith.constant 0 : index
    %c0_39 = arith.constant 0 : index
    %80 = vector.load %arg5[%c0_38, %c0_39] : memref<1x128xf32, #tpu.memory_space<vmem>>, vector<1x128xf32>
    %81 = arith.addf %79, %80 : vector<1x128xf32>
    %c0_40 = arith.constant 0 : index
    %c0_41 = arith.constant 0 : index
    %c0_42 = arith.constant 0 : index
    %82 = vector.load %arg6[%c0_40, %c0_41, %c0_42] : memref<1x1x128xf32, #tpu.memory_space<vmem>>, vector<1x1x128xf32>
    %83 = vector.shape_cast %82 : vector<1x1x128xf32> to vector<1x128xf32>
    %84 = vector.shape_cast %81 : vector<1x128xf32> to vector<1x1x128xf32>
    tpu.vector_store %arg6[%c0_40, %c0_41, %c0_42], %84 {strides = array<i32>} : memref<1x1x128xf32, #tpu.memory_space<vmem>>, vector<1x1x128xf32>,
    return
  }
  func.func @transform_0(%arg0: i32) -> (i32, i32, i32) {
    %c0_i32 = arith.constant 0 : i32
    %c0_i32_0 = arith.constant 0 : i32
    %c0_i32_1 = arith.constant 0 : i32
    return %arg0, %c0_i32, %c0_i32_0 : i32, i32, i32
  }
  func.func @transform_1(%arg0: i32) -> (i32, i32) {
    %c0_i32 = arith.constant 0 : i32
    %c0_i32_0 = arith.constant 0 : i32
    %c0_i32_1 = arith.constant 0 : i32
    return %c0_i32, %c0_i32_0 : i32, i32
  }
  func.func @transform_2(%arg0: i32) -> (i32, i32, i32) {
    %c0_i32 = arith.constant 0 : i32
    %c0_i32_0 = arith.constant 0 : i32
    %c0_i32_1 = arith.constant 0 : i32
    %c0_i32_2 = arith.constant 0 : i32
    return %c0_i32, %c0_i32_0, %c0_i32_1 : i32, i32, i32
  }
  func.func @transform_3(%arg0: i32) -> (i32, i32) {
    %c0_i32 = arith.constant 0 : i32
    %c0_i32_0 = arith.constant 0 : i32
    %c0_i32_1 = arith.constant 0 : i32
    return %c0_i32, %c0_i32_0 : i32, i32
  }
  func.func @transform_4(%arg0: i32) -> (i32, i32) {
    %c0_i32 = arith.constant 0 : i32
    %c0_i32_0 = arith.constant 0 : i32
    %c0_i32_1 = arith.constant 0 : i32
    return %c0_i32, %c0_i32_0 : i32, i32
  }
  func.func @transform_5(%arg0: i32) -> (i32, i32, i32) {
    %c0_i32 = arith.constant 0 : i32
    %c0_i32_0 = arith.constant 0 : i32
    %c0_i32_1 = arith.constant 0 : i32
    return %arg0, %c0_i32, %c0_i32_0 : i32, i32, i32
  }
}

</mosaic_0001>

<bundles_post_ra>
// kernel: multi_head_attention_forward.1
= control target key start
LH: loop header
LB: loop body
LE: loop exit
PB: predicated region body
PF: predicated region fallthrough
CT: control target
= control target key end

     0   :  { %10 = vsyncpa [#allocation4], 0  ;;  %s2444_s0 = inlined_call_operand.vmem [shape: f32[2,32,128], index: 0, kind: input, shape index: {}]   ;;  %s2445_s1 = inlined_call_operand.vmem [shape: f32[128,256], index: 1, kind: input, shape index: {}]   ;;  %s2446_s2 = inlined_call_operand.vmem [shape: f32[4,32,128], index: 2, kind: input, shape index: {}]   ;;  %s2447_s3 = inlined_call_operand.vmem [shape: f32[128,128], index: 3, kind: input, shape index: {}]   ;;  %s2448_s4 = inlined_call_operand.vmem [shape: f32[1,128], index: 4, kind: input, shape index: {}]   ;;  %s2449_s5 = inlined_call_operand.hbm [shape: f32[2,1,128], index: 5, kind: output, shape index: {}]  }
   0x1   :  { %12 = vsyncpa [#allocation4 + $0x1], 0  ;;  %s1965_s18 = smov 0   ;;  %s1967_s19 = smov 0  }
   0x2   :  { %s1969_s20 = smov 0   ;;  %s1971_s21 = smov 0  }
   0x3 LB: > { %s1986_s22 = sadd.s32 4294967295, %s1926_s21   ;;  %s1417_s23 = sadd.s32 4294967294, %s1926_s21   ;;  %s1926_s21 = sphi %s1971_s21, %s2457_s21   ;;  %s1922_s20 = sphi %s1969_s20, %s2456_s20   ;;  %s1918_s19 = sphi %s1967_s19, %s2455_s19   ;;  %s1914_s18 = sphi %s1965_s18, %s2454_s18  }
   0x4   : > { %s1990_s24 = sadd.s32 1, %s1926_s21   ;;  %s135_s25 = sadd.s32 1, %s1922_s20 }
   0x5   : > { %s132_s26 = ssub.s32 %s1926_s21, %s1990_s24  ;;  %p145_p0 = scmp.ne.s32.totalorder %s1922_s20, %s1918_s19 }
   0x6   : > { %p133_p1 = scmp.eq.s32.totalorder %s132_s26, 0  ;;  %p146_p2 = scmp.eq.s32.totalorder %s1986_s22, 1 }
   0x7   : > { %p151_p3 = scmp.ne.s32.totalorder %s1918_s19, %s1914_s18  ;;  %p152_p4 = scmp.eq.s32.totalorder %s1417_s23, 1 }
   0x8   : > { %s2001_s27 = scalar_select %p133_p1, %s1922_s20, %s135_s25  }
   0x9   : > { %p2003_p5 = por %p146_p2, %p145_p0  ;;  %p2007_p6 = por %p152_p4, %p151_p3 }
   0xa   : > { %p1420_p7 = scmp.ge.s32.totalorder %s1926_s21, 1  ;;  %p190_p8 = scmp.lt.s32.totalorder %s1926_s21, 3 }
   0xc   : > { %p191_p9 = pnand %p1420_p7, %p190_p8 }
   0xd   : > { %v243_v0 = vld [vmem:[%s2445_s1 + $0x8] sm:$0xff] (!%p191_p9)  ;;  %v245_v1 = vld [vmem:[%s2445_s1 + $0x18] sm:$0xff] (!%p191_p9)  ;;  %v242_v2 = vld [vmem:[%s2445_s1] sm:$0xff] (!%p191_p9)  ;;  %p217_p10 = scmp.lt.s32.totalorder (!%p191_p9), %s1986_s22, 1  ;;  %v1928_v7 = vmov (!%p191_p9), 0.0   ;;  %v1929_v61 = vmov (!%p191_p9), 0.0|0.0   ;;  %v415_v62 = vlaneseq (!%p191_p9) }
   0xe   : > { %194 = sbr.rel (%p191_p9) target bundleno = 2509 (0x9cd), region = 40  ;;  %v1631_v3 = vpack.c.bf16 (!%p191_p9), %v245_v1, %v243_v0  ;;  %v244_v4 = vld [vmem:[%s2445_s1 + $0x10] sm:$0xff] (!%p191_p9)  ;;  %v247_v5 = vld [vmem:[%s2445_s1 + $0x28] sm:$0xff] (!%p191_p9)  ;;  %v249_v6 = vld [vmem:[%s2445_s1 + $0x38] sm:$0xff] (!%p191_p9)  ;;  %338 = vmatprep.mubr.f32.mxu0 (!%p191_p9), %v1928_v7  ;;  %1671 = vmatprep.subr.bf16.mxu1 (!%p191_p9), %v1929_v61  ;;  %vm1930_vm0 = vmmov (!%p191_p9), 0   ;;  %vm442_vm1 = vcmask (!%p191_p9), 261120  }
   0xf   : > { %v1633_v8 = vpack.c.bf16 (!%p191_p9), %v244_v4, %v242_v2  ;;  %v1635_v9 = vpack.c.bf16 (!%p191_p9), %v249_v6, %v247_v5  ;;  %v246_v10 = vld [vmem:[%s2445_s1 + $0x20] sm:$0xff] (!%p191_p9)  ;;  %v248_v11 = vld [vmem:[%s2445_s1 + $0x30] sm:$0xff] (!%p191_p9)  ;;  %v251_v12 = vld [vmem:[%s2445_s1 + $0x48] sm:$0xff] (!%p191_p9)  ;;  %1527 = vmatprep.mubr.msk.f32.mxu1 (!%p191_p9), %vm1930_vm0, %v1928_v7  ;;  %v416_v63 = vand.u32 (!%p191_p9), 127, %v415_v62  ;;  %vm426_vm3 = vcmask (!%p191_p9), 130112   ;;  %s1931_s11 = smov (!%p191_p9), 96  }
  0x10   : > { %1632 = vmatprep.subr.bf16.mxu0 (!%p191_p9), %v1631_v3  ;;  %v253_v13 = vld [vmem:[%s2445_s1 + $0x58] sm:$0xff] (!%p191_p9)  ;;  %v1637_v14 = vpack.c.bf16 (!%p191_p9), %v248_v11, %v246_v10  ;;  %v250_v16 = vld [vmem:[%s2445_s1 + $0x40] sm:$0xff] (!%p191_p9)  ;;  %v252_v17 = vld [vmem:[%s2445_s1 + $0x50] sm:$0xff] (!%p191_p9)  ;;  %v418_v3 = vshrl.u32 (!%p191_p9), %v415_v62, 7  ;;  %vm433_vm4 = vcmask (!%p191_p9), 195712   ;;  %vm440_vm5 = vcmask (!%p191_p9), 261312  }
  0x11   : > { %1634 = vmatpush1.bf16.msra.mxu0 (!%p191_p9), %v1633_v8  ;;  %v1639_v15 = vpack.c.bf16 (!%p191_p9), %v253_v13, %v251_v12  ;;  %v255_v18 = vld [vmem:[%s2445_s1 + $0x68] sm:$0xff] (!%p191_p9)  ;;  %v257_v19 = vld [vmem:[%s2445_s1 + $0x78] sm:$0xff] (!%p191_p9)  ;;  %v1641_v20 = vpack.c.bf16 (!%p191_p9), %v252_v17, %v250_v16  ;;  %v254_v22 = vld [vmem:[%s2445_s1 + $0x60] sm:$0xff] (!%p191_p9)  ;;  %v421_v4 = vadd.s32 (!%p191_p9), 4294967288, %v416_v63  ;;  %v428_v8 = vadd.s32 (!%p191_p9), 4294967280, %v416_v63  ;;  %s1932_s15 = smov (!%p191_p9), 64  }
  0x12   : > { %1636 = vmatprep.subr.bf16.mxu0 (!%p191_p9), %v1635_v9  ;;  %v1643_v21 = vpack.c.bf16 (!%p191_p9), %v257_v19, %v255_v18  ;;  %v256_v23 = vld [vmem:[%s2445_s1 + $0x70] sm:$0xff] (!%p191_p9)  ;;  %v259_v24 = vld [vmem:[%s2445_s1 + $0x88] sm:$0xff] (!%p191_p9)  ;;  %v261_v25 = vld [vmem:[%s2445_s1 + $0x98] sm:$0xff] (!%p191_p9)  ;;  %vm528_vm6 = vcmask (!%p191_p9), 253952   ;;  %vm830_vm7 = vcmask (!%p191_p9), 516352   ;;  %vm1044_vm8 = vcmask (!%p191_p9), 778752  }
  0x13   : > { %v258_v26 = vld [vmem:[%s2445_s1 + $0x80] sm:$0xff] (!%p191_p9)  ;;  %v1645_v29 = vpack.c.bf16 (!%p191_p9), %v256_v23, %v254_v22  ;;  %v228_v31 = vld [vmem:[%s2446_s2 + $0x10] sm:$0xff] (!%p191_p9)  ;;  %v227_v32 = vld [vmem:[%s2446_s2 + $0x8] sm:$0xff] (!%p191_p9)  ;;  %v1647_v33 = vpack.c.bf16 (!%p191_p9), %v261_v25, %v259_v24  ;;  %v2166_v16 = vsub.s32 (!%p191_p9), %v421_v4, %v418_v3  ;;  %v2168_v18 = vsub.s32 (!%p191_p9), %v428_v8, %v418_v3  ;;  %s215_s17 = sand.u32 (!%p191_p9), 1, %s1918_s19   ;;  %s1447_s25 = sshll.u32 (!%p191_p9), %s1986_s22, 4 }
  0x14   : > { %v226_v30 = vld [vmem:[%s2446_s2] sm:$0xff] (!%p191_p9)  ;;  %v260_v34 = vld [vmem:[%s2445_s1 + $0x90] sm:$0xff] (!%p191_p9)  ;;  %v263_v35 = vld [vmem:[%s2445_s1 + $0xa8] sm:$0xff] (!%p191_p9)  ;;  %vm1258_vm9 = vcmask (!%p191_p9), 1041152   ;;  %s216_s26 = scalar_lea.vmem (!%p191_p9), [#allocation3], %s215_s17  ;;  %s1350_s9 = scalar_lea.sflag (!%p191_p9), [#allocation4], %s215_s17 }
  0x15   : > { %s218_s7 = scalar_select %p217_p10, %s1986_s22, 1  ;;  %1638 = vmatpush1.bf16.msra.mxu0 %v1637_v14  ;;  %v229_v38 = vld [vmem:[%s2446_s2 + $0x18] sm:$0xff]  ;;  %v1649_v44 = vpack.c.bf16 %v260_v34, %v258_v26  ;;  %v262_v46 = vld [vmem:[%s2445_s1 + $0xa0] sm:$0xff]  ;;  %v264_v47 = vld [vmem:[%s2445_s1 + $0xb0] sm:$0xff]  ;;  %v2164_v14 = vsub.s32 %v416_v63, %v418_v3 }
  0x16   : > { %1640 = vmatprep.subr.bf16.mxu0 %v1639_v15  ;;  %v265_v39 = vld [vmem:[%s2445_s1 + $0xb8] sm:$0xff]  ;;  %v267_v48 = vld [vmem:[%s2445_s1 + $0xc8] sm:$0xff]  ;;  %v1653_v50 = vpack.c.bf16 %v264_v47, %v262_v46  ;;  %v266_v52 = vld [vmem:[%s2445_s1 + $0xc0] sm:$0xff]  ;;  %s1362_s6 = sshll.u32 %s216_s26, 4  ;;  %s1934_s22 = smov [#allocation3]   ;;  %s2404_s6 = int_to_ptr.vmem [resolvable:$true] %s1362_s6 }
  0x17   : > { %s1450_s14 = sshll.u32 %s218_s7, 5  ;;  %v1651_v45 = vpack.c.bf16 %v265_v39, %v263_v35  ;;  %v269_v49 = vld [vmem:[%s2445_s1 + $0xd8] sm:$0xff]  ;;  %v268_v53 = vld [vmem:[%s2445_s1 + $0xd0] sm:$0xff]  ;;  %v271_v54 = vld [vmem:[%s2445_s1 + $0xe8] sm:$0xff]  ;;  %s2402_s7 = scalar_lea.hbm %s2449_s5, %s1447_s25 }
  0x18   : > { %s221_s30 = scalar_lea.vmem %s2444_s0, %s1450_s14  ;;  %v1655_v51 = vpack.c.bf16 %v269_v49, %v267_v48  ;;  %v273_v55 = vld [vmem:[%s2445_s1 + $0xf8] sm:$0xff]  ;;  %v1657_v56 = vpack.c.bf16 %v268_v53, %v266_v52  ;;  %v270_v58 = vld [vmem:[%s2445_s1 + $0xe0] sm:$0xff]  ;;  %v272_v59 = vld [vmem:[%s2445_s1 + $0xf0] sm:$0xff]  ;;  %s1933_s14 = smov 32  }
  0x19   : > { %v2076_v27 = vld [vmem:[%s221_s30] sm:$0xff]  ;;  %v2078_v28 = vld [vmem:[%s221_s30 + $0x10] sm:$0xff]  ;;  %1642 = vmatpush1.bf16.msra.mxu0 %v1641_v20  ;;  %v2103_v40 = vld [vmem:[%s221_s30 + $0x8] sm:$0xff]  ;;  %v1659_v57 = vpack.c.bf16 %v273_v55, %v271_v54  ;;  %v1661_v60 = vpack.c.bf16 %v272_v59, %v270_v58  ;;  %v435_v20 = vadd.s32 4294967272, %v416_v63  ;;  %s1864_s10 = scalar_lea.vmem %s2404_s6, 16  ;;  %s1868_s12 = sshll.u32 %s1934_s22, 4  ;;  %s1869_s12 = int_to_ptr.vmem [resolvable:$false] %s1868_s12 }
  0x1a   : > { %1644 = vmatprep.subr.bf16.mxu0 %v1643_v21  ;;  %v363_v36 = vmul.f32 %v226_v30, %v2076_v27  ;;  %v365_v37 = vmul.f32 %v228_v31, %v2078_v28  ;;  %v2105_v41 = vld [vmem:[%s221_s30 + $0x18] sm:$0xff]  ;;  %v364_v42 = vmul.f32 %v227_v32, %v2103_v40  ;;  %vm2154_vm2 = vmpackc.low %vm442_vm1, %vm442_vm1  ;;  %v232_v47 = vld [vmem:[%s2446_s2 + $0x30] sm:$0xff]  ;;  %p1865_p11 = scmp.ne.s32.totalorder %s2404_s6, %s1864_s10  ;;  %s1870_s13 = scalar_lea.vmem %s1869_s12, 32 }
  0x1b   : > { %v366_v43 = vmul.f32 %v229_v38, %v2105_v41  ;;  %v2175_v26 = vsub.s32 %v435_v20, %v418_v3  ;;  %v369_v48 = vmul.f32 %v232_v47, %v2078_v28  ;;  %v233_v49 = vld [vmem:[%s2446_s2 + $0x38] sm:$0xff]  ;;  %v235_v53 = vld [vmem:[%s2446_s2 + $0x48] sm:$0xff]  ;;  %v236_v63 = vld [vmem:[%s2446_s2 + $0x50] sm:$0xff]  ;;  %p1871_p0 = scmp.lt.s32.totalorder %s2404_s6, %s1869_s12  ;;  %p1872_p1 = scmp.lt.s32.totalorder %s1870_s13, %s1864_s10 }
  0x1c   : > { %379 = vadd.xlane.f32.xlu0 %v363_v36  ;;  %383 = vadd.xlane.f32.xlu1 %v365_v37  ;;  %v372_v54 = vmul.f32 %v235_v53, %v2103_v40  ;;  %p1866_p12 = pnand %p1865_p11, %p2003_p5 }
  0x1d   : > { %1646 = vmatpush1.bf16.msra.mxu0 %v1645_v29  ;;  %p1873_p2 = por %p1872_p1, %p1871_p0 }
  0x1e   : > { %1648 = vmatprep.subr.bf16.mxu0 %v1647_v33  ;;  %p1867_p13 = pneg %p1866_p12 }
  0x20   : > { %381 = vadd.xlane.f32.xlu0 %v364_v42  ;;  %385 = vadd.xlane.f32.xlu1 %v366_v43  ;;  %p1874_p3 = pnand %p1873_p2, %p1867_p13 }
  0x21   : > { %1650 = vmatpush1.bf16.msra.mxu0 %v1649_v44  ;;  %v230_v44 = vld [vmem:[%s2446_s2 + $0x20] sm:$0xff] }
  0x22   : > { %1652 = vmatprep.subr.bf16.mxu0 %v1651_v45  ;;  %v367_v46 = vmul.f32 %v230_v44, %v2076_v27 }
  0x25   : > { %1654 = vmatpush1.bf16.msra.mxu0 %v1653_v50  ;;  %v370_v50 = vmul.f32 %v233_v49, %v2105_v41 }
  0x26   : > { %1656 = vmatprep.subr.bf16.mxu0 %v1655_v51  ;;  %v231_v51 = vld [vmem:[%s2446_s2 + $0x28] sm:$0xff] }
  0x27   : > { %v368_v52 = vmul.f32 %v231_v51, %v2103_v40 }
  0x29   : > { %1658 = vmatpush1.bf16.msra.mxu0 %v1657_v56  ;;  %389 = vadd.xlane.f32.xlu1 %v368_v52 }
  0x2a   : > { %1660 = vmatprep.subr.bf16.mxu0 %v1659_v57 }
  0x2d   : > { %1662 = vmatpush1.bf16.msra.mxu0 %v1661_v60  ;;  %v234_v60 = vld [vmem:[%s2446_s2 + $0x40] sm:$0xff] }
  0x2e   : > { %1663 = vmatprep.subr.bf16.mxu0 %v1929_v61  ;;  %v371_v62 = vmul.f32 %v234_v60, %v2076_v27 }
  0x30   : > { %339 = vmatmul.mubr.f32.vlgmr.msra.gmra.mrb[0].mxu0 %v2076_v27 }
  0x31   : > { %344 = vmatprep.mubr.f32.mxu0 %v1928_v7 }
  0x34   : > { %345 = vmatmul.mubr.f32.gmra.mrb[2].mxu0 %v2103_v40 }
  0x35   : > { %350 = vmatprep.mubr.f32.mxu0 %v1928_v7 }
  0x38   : > { %351 = vmatmul.mubr.f32.gmra.mrb[4].mxu0 %v2078_v28 }
  0x39   : > { %356 = vmatprep.mubr.f32.mxu0 %v1928_v7 }
  0x3c   : > { %357 = vmatmul.mubr.f32.gmra.mrb[6].mxu0 %v2105_v41 }
  0x3d   : > { %1516 = vmatprep.mubr.msk.f32.mxu0 %vm1930_vm0, %v1928_v7 }
  0xa9   : > { %v380_v2 = vpop.xlane.xlu0 %379  ;;  %v384_v15 = vpop.xlane.xlu1 %383 }
  0xaa   : > { %v420_v22 = vrot.slane %v380_v2, %v2164_v14  ;;  %v432_v24 = vrot.slane %v384_v15, %v2168_v18 }
  0xad   : > { %v382_v19 = vpop.xlane.xlu0 %381  ;;  %v386_v32 = vpop.xlane.xlu1 %385 }
  0xae   : > { %v425_v23 = vrot.slane %v382_v19, %v2166_v16  ;;  %v439_v36 = vrot.slane %v386_v32, %v2175_v26 }
  0xb0   : > { %v427_v35 = vsel %vm426_vm3, %v425_v23, %v420_v22 }
  0xb1   : > { %v434_v37 = vsel %vm433_vm4, %v432_v24, %v427_v35 }
  0xb2   : > { %v441_v38 = vsel %vm440_vm5, %v439_v36, %v434_v37 }
  0xb6   : > { %v390_v4 = vpop.xlane.xlu1 %389 }
 0x103   : > { %v340_v0 = vpop.f32.mrb[0].mxu0 }
 0x104   : > { %v342_v1 = vpop.f32.mrb[1].mxu0 }
 0x107   : > { %v346_v5 = vpop.f32.mrb[2].mxu0 }
 0x108   : > { %v1664_v9 = vpack.c.bf16 %v346_v5, %v340_v0  ;;  %v348_v10 = vpop.f32.mrb[3].mxu0  ;;  %v2158_v11 = vpack.i.bf16 %v346_v5, %v340_v0  ;;  %v373_v0 = vmul.f32 %v236_v63, %v2078_v28 }
 0x109   : > { %v1672_v12 = vpack.c.bf16 %v348_v10, %v342_v1  ;;  %v2160_v13 = vpack.i.bf16 %v348_v10, %v342_v1  ;;  %v237_v1 = vld [vmem:[%s2446_s2 + $0x58] sm:$0xff] }
 0x10a   : > { %1666 = vmatpush3.bf16.xpose.msk.msra.mxu0 %vm2154_vm2, %v1664_v9  ;;  %v374_v2 = vmul.f32 %v237_v1, %v2105_v41 }
 0x10b   : > { %v352_v17 = vpop.f32.mrb[4].mxu0  ;;  %1673 = vmatpush3.bf16.msra.mxu1 %v1672_v12  ;;  %1667 = vmatprep.subr.bf16.mxu0 %v1929_v61 }
 0x10c   : > { %v354_v21 = vpop.f32.mrb[5].mxu0  ;;  %1674 = vmatprep.subr.bf16.mxu1 %v1929_v61 }
 0x10f   : > { %v358_v25 = vpop.f32.mrb[6].mxu0 }
 0x110   : > { %v1668_v29 = vpack.c.bf16 %v358_v25, %v352_v17  ;;  %v360_v30 = vpop.f32.mrb[7].mxu0  ;;  %v2177_v31 = vpack.i.bf16 %v358_v25, %v352_v17 }
 0x111   : > { %v1675_v33 = vpack.c.bf16 %v360_v30, %v354_v21  ;;  %v2179_v34 = vpack.i.bf16 %v360_v30, %v354_v21 }
 0x112   : > { %1670 = vmatpush3.bf16.xpose.msk.msra.mxu0 %vm2154_vm2, %v1668_v29  ;;  %v625_v29 = vrot.slane %v390_v4, %v2166_v16 }
 0x113   : > { %1676 = vmatpush3.bf16.msra.mxu1 %v1675_v33  ;;  %1685 = vmatprep.subr.bf16.mxu0 %v1929_v61 }
 0x114   : > { %1677 = vmatprep.subr.bf16.mxu1 %v1929_v61 }
 0x119   : > { %1517 = vmatmul.mubr.msk.f32.vlgmr.msra.gmra.mrb[8].mxu0 %vm442_vm1, %v441_v38 }
 0x11a   : > { %1549 = vmatprep.mubr.msk.f32.mxu0 %vm1930_vm0, %v1928_v7 }
 0x1ec   : > { %v523_v39 = vpop.f32.mrb[8].mxu0 }
 0x1ed   : > { %v527_v42 = vmul.f32 0.17677669, %v523_v39  ;;  %v1518_v43 = vpop.f32.mrb[9].mxu0 }
 0x1ef   : > { %v529_v45 = vsel %vm528_vm6, %v527_v42, -inf }
 0x1f0   : > { %530 = vmax.xlane.f32.xlu0 %v529_v45 }
 0x1f4   : > { %387 = vadd.xlane.f32.xlu0 %v367_v46 }
 0x1f8   : > { %391 = vadd.xlane.f32.xlu0 %v369_v48 }
 0x1fc   : > { %393 = vadd.xlane.f32.xlu0 %v370_v50 }
 0x212   : > { %1794 = vrot.lane.b32.xlu0 %v2177_v31, %s1931_s11 }
 0x231   : > { %397 = vadd.xlane.f32.xlu0 %v372_v54 }
 0x247   : > { %1799 = vrot.lane.b32.xlu0 %v2158_v11, %s1932_s15 }
 0x27d   : > { %v531_v55 = vpop.xlane.xlu0 %530 }
 0x27e   : > { %v532_v56 = vsub.f32 %v527_v42, %v531_v55 }
 0x280   : > { %v533_v57 = vmul.f32 1.442695, %v532_v56 }
 0x281   : > { %v388_v3 = vpop.xlane.xlu0 %387 }
 0x282   : > { %1848 = vpow2.f32 %v533_v57  ;;  %v621_v25 = vrot.slane %v388_v3, %v2164_v14 }
 0x284   : > { %v626_v35 = vsel %vm426_vm3, %v625_v29, %v621_v25 }
 0x285   : > { %v392_v5 = vpop.xlane.xlu0 %391 }
 0x286   : > { %v630_v32 = vrot.slane %v392_v5, %v2168_v18  ;;  %v239_v5 = vld [vmem:[%s2446_s2 + $0x68] sm:$0xff] }
 0x288   : > { %v631_v39 = vsel %vm433_vm4, %v630_v32, %v626_v35 }
 0x289   : > { %v394_v9 = vpop.xlane.xlu0 %393 }
 0x28a   : > { %v635_v36 = vrot.slane %v394_v9, %v2175_v26  ;;  %v238_v9 = vld [vmem:[%s2446_s2 + $0x60] sm:$0xff] }
 0x28c   : > { %v1849_v58 = vpop.eup %1848  ;;  %v636_v43 = vsel %vm440_vm5, %v635_v36, %v631_v39 }
 0x28d   : > { %v535_v59 = vsel %vm528_vm6, %v1849_v58, 0.0  ;;  %v1795_v19 = vpop.permute.xlu0 %1794 }
 0x28e   : > { %536 = vadd.xlane.f32.xlu1 %v535_v59  ;;  %v1797_v23 = vunpack.i.h.bf16 %v1795_v19  ;;  %v1796_v24 = vunpack.i.l.bf16 %v1795_v19  ;;  %v240_v19 = vld [vmem:[%s2446_s2 + $0x70] sm:$0xff] }
 0x290   : > { %v1682_v30 = vpack.c.bf16 %v1797_v23, %v1796_v24 }
 0x29f   : > { %1789 = vrot.lane.b32.xlu1 %v2158_v11, %s1931_s11 }
 0x2be   : > { %v398_v22 = vpop.xlane.xlu0 %397 }
 0x2bf   : > { %v843_v51 = vrot.slane %v398_v22, %v2166_v16  ;;  %v241_v22 = vld [vmem:[%s2446_s2 + $0x78] sm:$0xff] }
 0x2c2   : > { %v1800_v33 = vpop.permute.xlu0 %1799 }
 0x2c3   : > { %395 = vadd.xlane.f32.xlu1 %v371_v62  ;;  %v1802_v37 = vunpack.i.h.bf16 %v1800_v33  ;;  %v1801_v38 = vunpack.i.l.bf16 %v1800_v33 }
 0x2c5   : > { %v1692_v42 = vpack.c.bf16 %v1802_v37, %v1801_v38 }
 0x2c7   : > { %399 = vadd.xlane.f32.xlu1 %v373_v0 }
 0x2cb   : > { %401 = vadd.xlane.f32.xlu1 %v374_v2 }
 0x2dc   : > { %1804 = vrot.lane.b32.xlu1 %v2177_v31, %s1932_s15 }
 0x31b   : > { %v537_v8 = vpop.xlane.xlu1 %536 }
 0x31c   : > { %1850 = vrcp.f32 %v537_v8  ;;  %v376_v8 = vmul.f32 %v239_v5, %v2103_v40 }
 0x31f   : > { %v1790_v10 = vpop.permute.xlu1 %1789 }
 0x320   : > { %v1792_v12 = vunpack.i.h.bf16 %v1790_v10  ;;  %v1791_v15 = vunpack.i.l.bf16 %v1790_v10  ;;  %v375_v10 = vmul.f32 %v238_v9, %v2076_v27  ;;  %v378_v27 = vmul.f32 %v241_v22, %v2105_v41 }
 0x322   : > { %v1678_v21 = vpack.c.bf16 %v1792_v12, %v1791_v15 }
 0x326   : > { %v1851_v17 = vpop.eup %1850 }
 0x327   : > { %v539_v20 = vmul.f32 %v1851_v17, %v1849_v58 }
 0x329   : > { %1528 = vmatmul.mubr.msk.f32.vlgmr.msra.gmra.mrb[0].mxu1 %vm442_vm1, %v539_v20 }
 0x32a   : > { %1680 = vmatpush3.bf16.xpose.msk.msra.mxu1 %vm2154_vm2, %v1678_v21  ;;  %1538 = vmatprep.mubr.msk.f32.mxu1 %vm1930_vm0, %v1928_v7  ;;  %v377_v21 = vmul.f32 %v240_v19, %v2078_v28 }
 0x32b   : > { %1681 = vmatprep.subr.bf16.mxu1 %v1929_v61 }
 0x332   : > { %1684 = vmatpush3.bf16.xpose.msk.msra.mxu1 %vm2154_vm2, %v1682_v30 }
 0x333   : > { %1691 = vmatprep.subr.bf16.mxu1 %v1929_v61 }
 0x339   : > { %1539 = vmatmul.mubr.msk.f32.vlgmr.msra.gmra.mrb[2].mxu1 %vm442_vm1, %v636_v43 }
 0x33a   : > { %1694 = vmatpush3.bf16.xpose.msk.msra.mxu1 %vm2154_vm2, %v1692_v42  ;;  %1560 = vmatprep.mubr.msk.f32.mxu1 %vm1930_vm0, %v1928_v7 }
 0x33b   : > { %1695 = vmatprep.subr.bf16.mxu1 %v1929_v61 }
 0x350   : > { %v396_v44 = vpop.xlane.xlu1 %395 }
 0x351   : > { %v839_v52 = vrot.slane %v396_v44, %v2164_v14 }
 0x353   : > { %v844_v55 = vsel %vm426_vm3, %v843_v51, %v839_v52 }
 0x354   : > { %v400_v45 = vpop.xlane.xlu1 %399 }
 0x355   : > { %v848_v53 = vrot.slane %v400_v45, %v2168_v18 }
 0x357   : > { %v849_v56 = vsel %vm433_vm4, %v848_v53, %v844_v55 }
 0x358   : > { %v402_v46 = vpop.xlane.xlu1 %401 }
 0x359   : > { %v853_v54 = vrot.slane %v402_v46, %v2175_v26 }
 0x35b   : > { %v854_v57 = vsel %vm440_vm5, %v853_v54, %v849_v56 }
 0x35c   : > { %v1805_v47 = vpop.permute.xlu1 %1804 }
 0x35d   : > { %v1807_v48 = vunpack.i.h.bf16 %v1805_v47  ;;  %v1806_v49 = vunpack.i.l.bf16 %v1805_v47 }
 0x35f   : > { %v1696_v50 = vpack.c.bf16 %v1807_v48, %v1806_v49 }
 0x361   : > { %1698 = vmatpush3.bf16.xpose.msk.msra.mxu1 %vm2154_vm2, %v1696_v50 }
 0x362   : > { %1713 = vmatprep.subr.bf16.mxu1 %v1929_v61 }
 0x368   : > { %1561 = vmatmul.mubr.msk.f32.vlgmr.msra.gmra.mrb[4].mxu1 %vm442_vm1, %v854_v57 }
 0x369   : > { %1593 = vmatprep.mubr.msk.f32.mxu1 %vm1930_vm0, %v1928_v7 }
 0x3fc   : > { %v609_v58 = vpop.f32.mrb[0].mxu1 }
 0x3fd   : > { %613 = vst.msk [vmem:[#allocation2] sm:$0x1] %vm528_vm6, %v609_v58  ;;  %v1529_v59 = vpop.f32.mrb[1].mxu1 }
 0x40c   : > { %v721_v60 = vpop.f32.mrb[2].mxu1 }
 0x40d   : > { %v725_v62 = vmul.f32 0.17677669, %v721_v60  ;;  %v1540_v63 = vpop.f32.mrb[3].mxu1 }
 0x40f   : > { %v726_v0 = vsel %vm528_vm6, %v725_v62, -inf }
 0x410   : > { %727 = vmax.xlane.f32.xlu1 %v726_v0 }
 0x421   : > { %1814 = vrot.lane.b32.xlu1 %v2179_v34, %s1931_s11 }
 0x425   : > { %1819 = vrot.lane.b32.xlu1 %v2160_v13, %s1932_s15 }
 0x429   : > { %1824 = vrot.lane.b32.xlu1 %v2179_v34, %s1932_s15 }
 0x43b   : > { %v939_v1 = vpop.f32.mrb[4].mxu1 }
 0x43c   : > { %v943_v2 = vmul.f32 0.17677669, %v939_v1  ;;  %v1562_v3 = vpop.f32.mrb[5].mxu1 }
 0x43e   : > { %v944_v4 = vsel %vm528_vm6, %v943_v2, -inf }
 0x43f   : > { %945 = vmax.xlane.f32.xlu0 %v944_v4 }
 0x44d   : > { %405 = vadd.xlane.f32.xlu1 %v376_v8 }
 0x455   : > { %1809 = vrot.lane.b32.xlu0 %v2160_v13, %s1931_s11 }
 0x474   : > { %403 = vadd.xlane.f32.xlu0 %v375_v10 }
 0x49d   : > { %v728_v12 = vpop.xlane.xlu1 %727 }
 0x49e   : > { %v729_v15 = vsub.f32 %v725_v62, %v728_v12 }
 0x4a0   : > { %v730_v17 = vmul.f32 1.442695, %v729_v15 }
 0x4a1   : > { %v1815_v29 = vpop.permute.xlu1 %1814 }
 0x4a2   : > { %1852 = vpow2.f32 %v730_v17  ;;  %v1817_v33 = vunpack.i.h.bf16 %v1815_v29  ;;  %v1816_v35 = vunpack.i.l.bf16 %v1815_v29 }
 0x4a4   : > { %v1689_v41 = vpack.c.bf16 %v1817_v33, %v1816_v35 }
 0x4a5   : > { %v1820_v42 = vpop.permute.xlu1 %1819 }
 0x4a6   : > { %v1822_v43 = vunpack.i.h.bf16 %v1820_v42  ;;  %v1821_v44 = vunpack.i.l.bf16 %v1820_v42 }
 0x4a8   : > { %v1700_v48 = vpack.c.bf16 %v1822_v43, %v1821_v44  ;;  %v1266_v43 = vld [vmem:[%s2447_s3 + $0x28] sm:$0xff] }
 0x4a9   : > { %v1825_v45 = vpop.permute.xlu1 %1824 }
 0x4aa   : > { %v1827_v49 = vunpack.i.h.bf16 %v1825_v45  ;;  %v1826_v50 = vunpack.i.l.bf16 %v1825_v45  ;;  %v1267_v45 = vld [vmem:[%s2447_s3 + $0x30] sm:$0xff] }
 0x4ac   : > { %v1853_v40 = vpop.eup %1852 }
 0x4ad   : > { %v732_v20 = vsel %vm528_vm6, %v1853_v40, 0.0 }
 0x4ae   : > { %733 = vadd.xlane.f32.xlu0 %v732_v20 }
 0x4b2   : > { %407 = vadd.xlane.f32.xlu0 %v377_v21 }
 0x4b6   : > { %409 = vadd.xlane.f32.xlu0 %v378_v27 }
 0x4cc   : > { %1829 = vrot.lane.b32.xlu0 %v2158_v11, %s1933_s14  ;;  %v946_v23 = vpop.xlane.xlu0 %945 }
 0x4cd   : > { %v947_v24 = vsub.f32 %v943_v2, %v946_v23 }
 0x4cf   : > { %v948_v25 = vmul.f32 1.442695, %v947_v24 }
 0x4d0   : > { %v1810_v30 = vpop.permute.xlu0 %1809 }
 0x4d1   : > { %1854 = vpow2.f32 %v948_v25  ;;  %v1812_v32 = vunpack.i.h.bf16 %v1810_v30  ;;  %v1811_v28 = vunpack.i.l.bf16 %v1810_v30 }
 0x4d3   : > { %v1686_v36 = vpack.c.bf16 %v1812_v32, %v1811_v28 }
 0x4d5   : > { %1687 = vmatpush3.bf16.msra.mxu0 %v1686_v36 }
 0x4d6   : > { %1688 = vmatprep.subr.bf16.mxu0 %v1929_v61 }
 0x4d9   : > { %1690 = vmatpush3.bf16.msra.mxu0 %v1689_v41 }
 0x4da   : > { %1699 = vmatprep.subr.bf16.mxu0 %v1929_v61  ;;  %v406_v52 = vpop.xlane.xlu1 %405 }
 0x4db   : > { %v1855_v37 = vpop.eup %1854  ;;  %v1057_v2 = vrot.slane %v406_v52, %v2166_v16 }
 0x4dc   : > { %v950_v11 = vsel %vm528_vm6, %v1855_v37, 0.0 }
 0x4dd   : > { %951 = vadd.xlane.f32.xlu1 %v950_v11  ;;  %v1263_v11 = vld [vmem:[%s2447_s3 + $0x10] sm:$0xff] }
 0x4ee   : > { %1834 = vrot.lane.b32.xlu1 %v2177_v31, %s1933_s14  ;;  %v1703_v31 = vpack.c.bf16 %v1827_v49, %v1826_v50  ;;  %v1270_v49 = vld [vmem:[%s2447_s3 + $0x48] sm:$0xff] }
 0x501   : > { %v404_v38 = vpop.xlane.xlu0 %403 }
 0x502   : > { %v1053_v1 = vrot.slane %v404_v38, %v2164_v14 }
 0x504   : > { %v1058_v5 = vsel %vm426_vm3, %v1057_v2, %v1053_v1 }
 0x53b   : > { %v734_v39 = vpop.xlane.xlu0 %733 }
 0x53c   : > { %1856 = vrcp.f32 %v734_v39  ;;  %v1264_v39 = vld [vmem:[%s2447_s3 + $0x18] sm:$0xff] }
 0x53d   : > { %v1723_v42 = vpack.c.bf16 %v1264_v39, %v1263_v11 }
 0x53f   : > { %v408_v51 = vpop.xlane.xlu0 %407 }
 0x540   : > { %v1062_v4 = vrot.slane %v408_v51, %v2168_v18  ;;  %v1272_v51 = vld [vmem:[%s2447_s3 + $0x58] sm:$0xff] }
 0x542   : > { %v1063_v9 = vsel %vm433_vm4, %v1062_v4, %v1058_v5 }
 0x543   : > { %v410_v53 = vpop.xlane.xlu0 %409 }
 0x544   : > { %v1067_v8 = vrot.slane %v410_v53, %v2175_v26  ;;  %v1273_v53 = vld [vmem:[%s2447_s3 + $0x60] sm:$0xff] }
 0x546   : > { %v1857_v46 = vpop.eup %1856  ;;  %v1068_v10 = vsel %vm440_vm5, %v1067_v8, %v1063_v9 }
 0x547   : > { %v736_v47 = vmul.f32 %v1857_v46, %v1853_v40  ;;  %v1830_v55 = vpop.permute.xlu0 %1829  ;;  %v1268_v46 = vld [vmem:[%s2447_s3 + $0x38] sm:$0xff] }
 0x548   : > { %v1832_v56 = vunpack.i.h.bf16 %v1830_v55  ;;  %v1831_v57 = vunpack.i.l.bf16 %v1830_v55 }
 0x549   : > { %1550 = vmatmul.mubr.msk.f32.vlgmr.msra.gmra.mrb[10].mxu0 %vm442_vm1, %v736_v47  ;;  %v1729_v47 = vpack.c.bf16 %v1268_v46, %v1267_v45 }
 0x54a   : > { %1701 = vmatpush3.bf16.msra.mxu0 %v1700_v48  ;;  %1571 = vmatprep.mubr.msk.f32.mxu0 %vm1930_vm0, %v1928_v7  ;;  %v1706_v60 = vpack.c.bf16 %v1832_v56, %v1831_v57  ;;  %v1269_v48 = vld [vmem:[%s2447_s3 + $0x40] sm:$0xff]  ;;  %v1275_v56 = vld [vmem:[%s2447_s3 + $0x70] sm:$0xff]  ;;  %v1276_v57 = vld [vmem:[%s2447_s3 + $0x78] sm:$0xff] }
 0x54b   : > { %1702 = vmatprep.subr.bf16.mxu0 %v1929_v61  ;;  %v1732_v50 = vpack.c.bf16 %v1270_v49, %v1269_v48 }
 0x54e   : > { %1704 = vmatpush3.bf16.msra.mxu0 %v1703_v31  ;;  %v1271_v31 = vld [vmem:[%s2447_s3 + $0x50] sm:$0xff] }
 0x54f   : > { %1705 = vmatprep.subr.bf16.mxu0 %v1929_v61  ;;  %v1735_v52 = vpack.c.bf16 %v1272_v51, %v1271_v31 }
 0x56a   : > { %v952_v54 = vpop.xlane.xlu1 %951 }
 0x56b   : > { %1858 = vrcp.f32 %v952_v54  ;;  %v1274_v54 = vld [vmem:[%s2447_s3 + $0x68] sm:$0xff] }
 0x56c   : > { %v1738_v55 = vpack.c.bf16 %v1274_v54, %v1273_v53 }
 0x56e   : > { %v1835_v62 = vpop.permute.xlu1 %1834 }
 0x56f   : > { %v1837_v63 = vunpack.i.h.bf16 %v1835_v62  ;;  %v1836_v0 = vunpack.i.l.bf16 %v1835_v62 }
 0x571   : > { %v1710_v3 = vpack.c.bf16 %v1837_v63, %v1836_v0  ;;  %v1277_v0 = vld [vmem:[%s2448_s4] sm:$0x1] }
 0x575   : > { %v1859_v58 = vpop.eup %1858 }
 0x576   : > { %v954_v59 = vmul.f32 %v1859_v58, %v1855_v37  ;;  %v1262_v37 = vld [vmem:[%s2447_s3 + $0x8] sm:$0xff]  ;;  %v1741_v58 = vpack.c.bf16 %v1276_v57, %v1275_v56 }
 0x578   : > { %1572 = vmatmul.mubr.msk.f32.vlgmr.msra.gmra.mrb[12].mxu0 %vm442_vm1, %v954_v59 }
 0x579   : > { %1708 = vmatpush3.bf16.xpose.msk.msra.mxu0 %vm2154_vm2, %v1706_v60  ;;  %1582 = vmatprep.mubr.msk.f32.mxu0 %vm1930_vm0, %v1928_v7 }
 0x57a   : > { %1709 = vmatprep.subr.bf16.mxu0 %v1929_v61 }
 0x581   : > { %1712 = vmatpush3.bf16.xpose.msk.msra.mxu0 %vm2154_vm2, %v1710_v3 }
 0x588   : > { %1583 = vmatmul.mubr.msk.f32.vlgmr.msra.gmra.mrb[14].mxu0 %vm442_vm1, %v1068_v10 }
 0x61c   : > { %v822_v12 = vpop.f32.mrb[10].mxu0 }
 0x61d   : > { %v1551_v14 = vpop.f32.mrb[11].mxu0 }
 0x64b   : > { %v1036_v15 = vpop.f32.mrb[12].mxu0 }
 0x64c   : > { %v1573_v16 = vpop.f32.mrb[13].mxu0 }
 0x65b   : > { %v1153_v17 = vpop.f32.mrb[14].mxu0 }
 0x65c   : > { %v1157_v19 = vmul.f32 0.17677669, %v1153_v17  ;;  %v1584_v18 = vpop.f32.mrb[15].mxu0 }
 0x65e   : > { %v1158_v40 = vsel %vm528_vm6, %v1157_v19, -inf }
 0x65f   : > { %1159 = vmax.xlane.f32.xlu1 %v1158_v40 }
 0x670   : > { %1844 = vrot.lane.b32.xlu1 %v2179_v34, %s1933_s14 }
 0x674   : > { %827 = vrot.lane.b32.xlu1 %v822_v12, %s1933_s14 }
 0x678   : > { %1041 = vrot.lane.b32.xlu1 %v1036_v15, %s1932_s15 }
 0x6ec   : > { %v1160_v6 = vpop.xlane.xlu1 %1159 }
 0x6ed   : > { %v1161_v26 = vsub.f32 %v1157_v19, %v1160_v6 }
 0x6ef   : > { %v1162_v20 = vmul.f32 1.442695, %v1161_v26 }
 0x6f0   : > { %v1845_v21 = vpop.permute.xlu1 %1844 }
 0x6f1   : > { %1860 = vpow2.f32 %v1162_v20  ;;  %v1847_v32 = vunpack.i.h.bf16 %v1845_v21  ;;  %v1846_v28 = vunpack.i.l.bf16 %v1845_v21 }
 0x6f3   : > { %v1717_v36 = vpack.c.bf16 %v1847_v32, %v1846_v28 }
 0x6f4   : > { %v828_v22 = vpop.permute.xlu1 %827 }
 0x6f5   : > { %831 = vst.msk [vmem:[#allocation2] sm:$0x1] %vm830_vm7, %v828_v22 }
 0x6f8   : > { %v1042_v27 = vpop.permute.xlu1 %1041 }
 0x6f9   : > { %1045 = vst.msk [vmem:[#allocation2] sm:$0x1] %vm1044_vm8, %v1042_v27 }
 0x6fb   : > { %v1861_v23 = vpop.eup %1860 }
 0x6fc   : > { %v1164_v24 = vsel %vm528_vm6, %v1861_v23, 0.0 }
 0x6fd   : > { %1165 = vadd.xlane.f32.xlu0 %v1164_v24 }
 0x713   : > { %1839 = vrot.lane.b32.xlu0 %v2160_v13, %s1933_s14  ;;  %v1261_v13 = vld [vmem:[%s2447_s3] sm:$0xff] }
 0x714   : > { %v1720_v38 = vpack.c.bf16 %v1262_v37, %v1261_v13 }
 0x78a   : > { %v1166_v34 = vpop.xlane.xlu0 %1165 }
 0x78b   : > { %1862 = vrcp.f32 %v1166_v34 }
 0x78e   : > { %v1840_v25 = vpop.permute.xlu0 %1839 }
 0x78f   : > { %v1842_v29 = vunpack.i.h.bf16 %v1840_v25  ;;  %v1841_v30 = vunpack.i.l.bf16 %v1840_v25 }
 0x791   : > { %v1714_v33 = vpack.c.bf16 %v1842_v29, %v1841_v30 }
 0x793   : > { %1715 = vmatpush3.bf16.msra.mxu1 %v1714_v33 }
 0x794   : > { %1716 = vmatprep.subr.bf16.mxu1 %v1929_v61 }
 0x795   : > { %v1863_v35 = vpop.eup %1862 }
 0x796   : > { %v1168_v41 = vmul.f32 %v1863_v35, %v1861_v23 }
 0x797   : > { %1718 = vmatpush3.bf16.msra.mxu1 %v1717_v36 }
 0x798   : > { %1719 = vmatprep.subr.bf16.mxu1 %v1929_v61 }
 0x79a   : > { %1594 = vmatmul.mubr.msk.f32.vlgmr.msra.gmra.mrb[6].mxu1 %vm442_vm1, %v1168_v41 }
 0x79b   : > { %1628 = vmatprep.mubr.msk.f32.mxu1 %vm1930_vm0, %v1928_v7  ;;  %1721 = vmatpush3.bf16.msra.mxu1 %v1720_v38  ;;  %v1265_v7 = vld [vmem:[%s2447_s3 + $0x20] sm:$0xff] }
 0x79c   : > { %1722 = vmatprep.subr.bf16.mxu1 %v1929_v61  ;;  %v1726_v44 = vpack.c.bf16 %v1266_v43, %v1265_v7 }
 0x79f   : > { %1724 = vmatpush3.bf16.msra.mxu1 %v1723_v42 }
 0x7a0   : > { %1725 = vmatprep.subr.bf16.mxu1 %v1929_v61 }
 0x7a3   : > { %1727 = vmatpush3.bf16.msra.mxu1 %v1726_v44 }
 0x7a4   : > { %1728 = vmatprep.subr.bf16.mxu1 %v1929_v61 }
 0x7a7   : > { %1730 = vmatpush3.bf16.msra.mxu1 %v1729_v47 }
 0x7a8   : > { %1731 = vmatprep.subr.bf16.mxu1 %v1929_v61 }
 0x7ab   : > { %1733 = vmatpush3.bf16.msra.mxu1 %v1732_v50 }
 0x7ac   : > { %1734 = vmatprep.subr.bf16.mxu1 %v1929_v61 }
 0x7af   : > { %1736 = vmatpush3.bf16.msra.mxu1 %v1735_v52 }
 0x7b0   : > { %1737 = vmatprep.subr.bf16.mxu1 %v1929_v61 }
 0x7b3   : > { %1739 = vmatpush3.bf16.msra.mxu1 %v1738_v55 }
 0x7b4   : > { %1740 = vmatprep.subr.bf16.mxu1 %v1929_v61 }
 0x7b7   : > { %1742 = vmatpush3.bf16.msra.mxu1 %v1741_v58 }
 0x86d   : > { %v1250_v59 = vpop.f32.mrb[6].mxu1 }
 0x86e   : > { %1255 = vrot.lane.b32.xlu0 %v1250_v59, %s1931_s11  ;;  %v1595_v60 = vpop.f32.mrb[7].mxu1 }
 0x8e0   : > { %v1256_v62 = vpop.permute.xlu0 %1255 }
 0x8e1   : > { %1259 = vst.msk [vmem:[#allocation2] sm:$0x1] %vm1258_vm9, %v1256_v62 }
 0x8e8   : > { %v1260_v63 = vld [vmem:[#allocation2] sm:$0x1] }
 0x8e9   : > { %1629 = vmatmul.mubr.f32.vlgmr.msra.gmra.mrb[8].mxu1 %v1260_v63 }
 0x9bc   : > { %v1344_v61 = vpop.f32.mrb[8].mxu1 }
 0x9bd   : > { %v1345_v1 = vadd.f32 %v1344_v61, %v1277_v0  ;;  %v1630_v2 = vpop.f32.mrb[9].mxu1 }
 0x9bf   : > { %1348 = vst [vmem:[%s216_s26] sm:$0x1] %v1345_v1 }
 0x9c0   : > { %1877 = shalt.err (!%p1874_p3)
}
 0x9c1   : > { %s1878_s14 = scalar_lea.hbm %s2402_s7, 16  ;;  %s1882_s17 = scalar_lea.hbm %s2449_s5, 32 }
 0x9c2   : > { %p1879_p4 = scmp.ne.s32.totalorder %s2402_s7, %s1878_s14  ;;  %p1883_p9 = scmp.lt.u32.totalorder %s2402_s7, %s2449_s5 }
 0x9c3   : > { %p1884_p10 = scmp.lt.u32.totalorder %s1882_s17, %s1878_s14  ;;  %p1886_p12 = scmp.lt.u32.totalorder %s1878_s14, %s2402_s7 }
 0x9c4   : > { %p1880_p7 = pnand %p1879_p4, %p2003_p5 }
 0x9c5   : > { %p1885_p11 = por %p1884_p10, %p1883_p9 }
 0x9c6   : > { %p1881_p8 = pneg %p1880_p7 }
 0x9c7   : > { %p1887_p13 = por %p1886_p12, %p1885_p11 }
 0x9c9   : > { %p1888_p0 = pnand %p1887_p13, %p1881_p8 }
 0x9cb   : > { %1891 = shalt.err (!%p1888_p0)
}
 0x9cc   : > { %1743 = dma.vmem_to_hbm [thread:$0]  (%p2003_p5), %s2404_s6, 16, %s2402_s7, %s1350_s9  }
 0x9cd PF: > { %p1749_p1 = scmp.ge.s32.totalorder %s1926_s21, 2  ;;  %s1374_s25 = sand.u32 1, %s1914_s18  }
 0x9ce   : > { %s1375_s26 = scalar_lea.sflag [#allocation4], %s1374_s25 }
 0x9cf   : > { %p1746_p2 = pnand %p1749_p1, %p2007_p6 }
 0x9d1   : > { %1909 = dma.done.wait (!%p1746_p2), %s1375_s26, 16  }
 0x9d2   : > { %1911 = vsyncadd (!%p1746_p2), %s1375_s26, 4294967280  ;;  %p15_p3 = scmp.ge.s32.totalorder %s1990_s24, 4   ;;  %s2454_s18 = smov %s1918_s19 }
 0x9d3   : > { %s2455_s19 = smov %s1922_s20  ;;  %s2456_s20 = smov %s2001_s27 }
 0x9d4   : > { %s2457_s21 = smov %s1990_s24  ;;  %17 = sbr.rel (!%p15_p3) target bundleno = 3 (0x3), region = 75 }
 0x9db   :  { %1379 = vsyncpa [#allocation4], 1 }
 0x9dc   :  { %1381 = vsyncpa [#allocation4 + $0x1], 1 }

</bundles_post_ra>
